<compile_context>
chip_gen: v6e
topology: v6e:2x2x1
jax: 0.10.0
libtpu: 0.0.40
codegen_flags: <defaults>
</compile_context>

<pallas_src>
import functools

import jax
import jax.numpy as jnp
from jax.experimental import pallas as pl
from jax.experimental.pallas import tpu as pltpu


# ----------------------------------------------------------------------------
# Kernels
# ----------------------------------------------------------------------------
def _wavepool_kernel_dense(x_ref, s_ref, d_ref, ll_ref, lh_ref, hl_ref, hh_ref, *, w):
    # x_ref : (tr, 2w)   each row = [input row 2i | input row 2i+1] of one channel
    # s_ref : (w, w//2)  horizontal low-pass  (0.5 folded in)
    # d_ref : (w, w//2)  horizontal high-pass (0.5 folded in)
    xp = x_ref[...]
    row_even = xp[:, :w]
    row_odd = xp[:, w:]
    vsum = row_even + row_odd            # vertical low-pass  (unscaled)
    vdiff = row_odd - row_even           # vertical high-pass (unscaled)
    s = s_ref[...]
    d = d_ref[...]
    ll_ref[...] = jnp.dot(vsum, s, preferred_element_type=jnp.float32).astype(ll_ref.dtype)
    lh_ref[...] = jnp.dot(vsum, d, preferred_element_type=jnp.float32).astype(lh_ref.dtype)
    hl_ref[...] = jnp.dot(vdiff, s, preferred_element_type=jnp.float32).astype(hl_ref.dtype)
    hh_ref[...] = jnp.dot(vdiff, d, preferred_element_type=jnp.float32).astype(hh_ref.dtype)


def _wavepool_kernel_fused(x_ref, f_ref, ll_ref, lh_ref, hl_ref, hh_ref, *, w, nk):
    # Block-diagonal / fused path (w % 256 == 0).
    # f_ref : (256, 256) = [s_blk | d_blk], reused for every 256-lane K chunk.
    xp = x_ref[...]
    row_even = xp[:, :w]                 # w multiple of 256 -> aligned slices
    row_odd = xp[:, w:]
    vsum = row_even + row_odd
    vdiff = row_odd - row_even
    f = f_ref[...]
    for k in range(nk):                  # static, small (nk = w // 256)
        ki = 256 * k
        ko = 128 * k
        sv = jnp.dot(vsum[:, ki:ki + 256], f, preferred_element_type=jnp.float32)
        dv = jnp.dot(vdiff[:, ki:ki + 256], f, preferred_element_type=jnp.float32)
        ll_ref[:, ko:ko + 128] = sv[:, :128].astype(ll_ref.dtype)
        lh_ref[:, ko:ko + 128] = sv[:, 128:].astype(lh_ref.dtype)
        hl_ref[:, ko:ko + 128] = dv[:, :128].astype(hl_ref.dtype)
        hh_ref[:, ko:ko + 128] = dv[:, 128:].astype(hh_ref.dtype)


# ----------------------------------------------------------------------------
# Tiling helpers
# ----------------------------------------------------------------------------
def _pick_tile_rows(r, row_bytes):
    """Row tile: per-step (single copy) in+out footprint <= ~8 MiB, multiple of
    8 (or the full row count); pl.cdiv handles the partial last block."""
    budget = 8 * 1024 * 1024
    t = budget // max(row_bytes, 1)
    if t >= r:
        return r
    return min(max(8, (t // 8) * 8), r)


# ----------------------------------------------------------------------------
# Wrapper
# ----------------------------------------------------------------------------
def wavepool(x):
    """Haar WavePool forward. x: (N, C, H, W). Returns (LL, LH, HL, HH)."""
    n, c, h, w = x.shape
    ho, wo = h // 2, w // 2
    dtype = x.dtype
    itemsize = jnp.dtype(dtype).itemsize

    if h % 2:
        # Rare odd-H case: stride-2 valid conv drops the trailing row.  The
        # slice-then-reshape costs one extra HBM pass of the input (cannot be
        # a pure view); acceptable since odd H is uncommon for pooling nets.
        x = x[:, :, : 2 * ho, :]

    r = n * c * ho
    # Free row-major view: rows (2i, 2i+1) of each channel become one row of 2W.
    x_rows = x.reshape(r, 2 * w)

    row_bytes = (2 * w + 4 * wo) * itemsize          # input row-pair + 4 half-rows
    tile_r = _pick_tile_rows(r, row_bytes)

    fused = (w >= 256) and (w % 256 == 0)
    if fused:
        nk = w // 256
        m = jnp.arange(128)
        # (256, 256) = [s_blk | d_blk]; 0.5 folded in (exact in bf16).
        cmat = (
            jnp.zeros((256, 256), dtype)
            .at[2 * m, m].set(0.5)
            .at[2 * m + 1, m].set(0.5)
            .at[2 * m, 128 + m].set(-0.5)
            .at[2 * m + 1, 128 + m].set(0.5)
        )
        consts = (cmat,)
        const_specs = [pl.BlockSpec((256, 256), lambda ri: (0, 0))]
        const_bytes = 256 * 256 * itemsize
        kernel = functools.partial(_wavepool_kernel_fused, w=w, nk=nk)
    else:
        # Dense path (small / odd W).  A trailing odd input column is ignored
        # automatically (all-zero final row).  NOTE: for W <= 64 the W/2-wide
        # outputs force masked partial stores (small-feature-map penalty).
        j = jnp.arange(wo)
        s_mat = jnp.zeros((w, wo), dtype).at[2 * j, j].set(0.5).at[2 * j + 1, j].set(0.5)
        d_mat = jnp.zeros((w, wo), dtype).at[2 * j, j].set(-0.5).at[2 * j + 1, j].set(0.5)
        consts = (s_mat, d_mat)
        const_specs = [
            pl.BlockSpec((w, wo), lambda ri: (0, 0)),
            pl.BlockSpec((w, wo), lambda ri: (0, 0)),
        ]
        const_bytes = 2 * w * wo * itemsize
        kernel = functools.partial(_wavepool_kernel_dense, w=w)

    grid = (pl.cdiv(r, tile_r),)
    out_sd = jax.ShapeDtypeStruct((r, wo), dtype)
    out_spec = pl.BlockSpec((tile_r, wo), lambda ri: (ri, 0))
    in_spec_x = pl.BlockSpec((tile_r, 2 * w), lambda ri: (ri, 0))

    # VMEM limit derived from the actual footprint: double-buffered in/out
    # tiles + (double-buffered) constants + slack; capped under v7x's 64 MiB.
    vmem_limit = 2 * tile_r * row_bytes + 2 * const_bytes + (8 << 20)
    vmem_limit = int(min(max(vmem_limit, 16 << 20), 56 << 20))

    outs = pl.pallas_call(
        kernel,
        out_shape=(out_sd, out_sd, out_sd, out_sd),
        grid=grid,
        in_specs=[in_spec_x] + const_specs,
        out_specs=(out_spec, out_spec, out_spec, out_spec),
        compiler_params=pltpu.CompilerParams(
            dimension_semantics=("parallel",),
            vmem_limit_bytes=vmem_limit,
        ),
    )(x_rows, *consts)

    return tuple(o.reshape(n, c, ho, wo) for o in outs)


# ----------------------------------------------------------------------------
# Pure-JAX reference (exact PyTorch depthwise 2x2 / stride-2 Haar conv)
# ----------------------------------------------------------------------------
def _ref_wavepool(x):
    ho, wo = x.shape[2] // 2, x.shape[3] // 2
    x = x[:, :, : 2 * ho, : 2 * wo]
    x00 = x[:, :, 0::2, 0::2]
    x01 = x[:, :, 0::2, 1::2]
    x10 = x[:, :, 1::2, 0::2]
    x11 = x[:, :, 1::2, 1::2]
    return (
        0.5 * (x00 + x01 + x10 + x11),    # LL
        0.5 * (-x00 + x01 - x10 + x11),   # LH
        0.5 * (-x00 - x01 + x10 + x11),   # HL
        0.5 * (x00 - x01 - x10 + x11),    # HH
    )


# ----------------------------------------------------------------------------
# Demo / self-check
# ----------------------------------------------------------------------------
if __name__ == "__main__":
    fwd = jax.jit(wavepool)
    key = jax.random.PRNGKey(0)

    cases = [
        (2, 4, 16, 16),   # spec example shape (dense path, small W)
        (1, 2, 8, 512),   # fused block-diagonal path, 2 K-chunks
        (1, 1, 9, 11),    # odd H / odd W -> trailing row/col dropped (dense)
    ]
    for shape in cases:
        key, sub = jax.random.split(key)
        x = jax.random.normal(sub, shape, jnp.float32)

        ll, lh, hl, hh = jax.block_until_ready(fwd(x))
        refs = _ref_wavepool(x)

        n, c, h, w = shape
        for out, ref in zip((ll, lh, hl, hh), refs):
            assert out.shape == (n, c, h // 2, w // 2), out.shape
            assert bool(jnp.all(jnp.isfinite(out)))
            err = float(jnp.max(jnp.abs(out - ref)))
            assert err < 1e-5, f"shape={shape} max abs error {err}"

    print("KERNEL_OK")
</pallas_src>

<mosaic_0001>
module attributes {stable_mosaic.version = 11 : i64} {
  func.func @_wavepool_kernel_dense(%arg0: i32, %arg1: memref<64x32xf32, #tpu.memory_space<vmem>>, %arg2: memref<16x8xf32, #tpu.memory_space<vmem>>, %arg3: memref<16x8xf32, #tpu.memory_space<vmem>>, %arg4: memref<64x8xf32, #tpu.memory_space<vmem>>, %arg5: memref<64x8xf32, #tpu.memory_space<vmem>>, %arg6: memref<64x8xf32, #tpu.memory_space<vmem>>, %arg7: memref<64x8xf32, #tpu.memory_space<vmem>>) attributes {dimension_semantics = [#tpu.dimension_semantics<parallel>], iteration_bounds = array<i64: 1>, scalar_prefetch = 0 : i64, scratch_operands = 0 : i64, tpu.core_type = #tpu.core_type<tc>, window_params = [{transform_indices = @transform_0, window_bounds = array<i64: 64, 32>}, {pipeline_mode = #tpu.pipeline_mode<synchronous>, transform_indices = @transform_1, window_bounds = array<i64: 16, 8>}, {pipeline_mode = #tpu.pipeline_mode<synchronous>, transform_indices = @transform_2, window_bounds = array<i64: 16, 8>}, {transform_indices = @transform_3, window_bounds = array<i64: 64, 8>}, {transform_indices = @transform_4, window_bounds = array<i64: 64, 8>}, {transform_indices = @transform_5, window_bounds = array<i64: 64, 8>}, {transform_indices = @transform_6, window_bounds = array<i64: 64, 8>}]} {
    %c0 = arith.constant 0 : index
    %c0_0 = arith.constant 0 : index
    %0 = vector.load %arg1[%c0, %c0_0] : memref<64x32xf32, #tpu.memory_space<vmem>>, vector<64x32xf32>
    %1 = vector.extract_strided_slice %0 {offsets = [0, 0], sizes = [64, 16], strides = [1, 1]} : vector<64x32xf32> to vector<64x16xf32>
    %2 = vector.extract_strided_slice %0 {offsets = [0, 16], sizes = [64, 16], strides = [1, 1]} : vector<64x32xf32> to vector<64x16xf32>
    %3 = arith.addf %1, %2 : vector<64x16xf32>
    %4 = arith.subf %2, %1 : vector<64x16xf32>
    %c0_1 = arith.constant 0 : index
    %c0_2 = arith.constant 0 : index
    %5 = vector.load %arg2[%c0_1, %c0_2] : memref<16x8xf32, #tpu.memory_space<vmem>>, vector<16x8xf32>
    %c0_3 = arith.constant 0 : index
    %c0_4 = arith.constant 0 : index
    %6 = vector.load %arg3[%c0_3, %c0_4] : memref<16x8xf32, #tpu.memory_space<vmem>>, vector<16x8xf32>
    %cst = arith.constant dense<0.000000e+00> : vector<64x8xf32>
    %7 = tpu.matmul %3, %5, %cst {dimension_numbers = #tpu.dot_dimension_numbers<[1], [0], [0], [1], [0, 0, 1, 1], [], []>} : vector<64x16xf32>, vector<16x8xf32>, vector<64x8xf32> -> vector<64x8xf32>
    %c0_5 = arith.constant 0 : index
    %c0_6 = arith.constant 0 : index
    %8 = vector.load %arg4[%c0_5, %c0_6] : memref<64x8xf32, #tpu.memory_space<vmem>>, vector<64x8xf32>
    tpu.vector_store %arg4[%c0_5, %c0_6], %7 {strides = array<i32>} : memref<64x8xf32, #tpu.memory_space<vmem>>, vector<64x8xf32>,
    %cst_7 = arith.constant dense<0.000000e+00> : vector<64x8xf32>
    %9 = tpu.matmul %3, %6, %cst_7 {dimension_numbers = #tpu.dot_dimension_numbers<[1], [0], [0], [1], [0, 0, 1, 1], [], []>} : vector<64x16xf32>, vector<16x8xf32>, vector<64x8xf32> -> vector<64x8xf32>
    %c0_8 = arith.constant 0 : index
    %c0_9 = arith.constant 0 : index
    %10 = vector.load %arg5[%c0_8, %c0_9] : memref<64x8xf32, #tpu.memory_space<vmem>>, vector<64x8xf32>
    tpu.vector_store %arg5[%c0_8, %c0_9], %9 {strides = array<i32>} : memref<64x8xf32, #tpu.memory_space<vmem>>, vector<64x8xf32>,
    %cst_10 = arith.constant dense<0.000000e+00> : vector<64x8xf32>
    %11 = tpu.matmul %4, %5, %cst_10 {dimension_numbers = #tpu.dot_dimension_numbers<[1], [0], [0], [1], [0, 0, 1, 1], [], []>} : vector<64x16xf32>, vector<16x8xf32>, vector<64x8xf32> -> vector<64x8xf32>
    %c0_11 = arith.constant 0 : index
    %c0_12 = arith.constant 0 : index
    %12 = vector.load %arg6[%c0_11, %c0_12] : memref<64x8xf32, #tpu.memory_space<vmem>>, vector<64x8xf32>
    tpu.vector_store %arg6[%c0_11, %c0_12], %11 {strides = array<i32>} : memref<64x8xf32, #tpu.memory_space<vmem>>, vector<64x8xf32>,
    %cst_13 = arith.constant dense<0.000000e+00> : vector<64x8xf32>
    %13 = tpu.matmul %4, %6, %cst_13 {dimension_numbers = #tpu.dot_dimension_numbers<[1], [0], [0], [1], [0, 0, 1, 1], [], []>} : vector<64x16xf32>, vector<16x8xf32>, vector<64x8xf32> -> vector<64x8xf32>
    %c0_14 = arith.constant 0 : index
    %c0_15 = arith.constant 0 : index
    %14 = vector.load %arg7[%c0_14, %c0_15] : memref<64x8xf32, #tpu.memory_space<vmem>>, vector<64x8xf32>
    tpu.vector_store %arg7[%c0_14, %c0_15], %13 {strides = array<i32>} : memref<64x8xf32, #tpu.memory_space<vmem>>, vector<64x8xf32>,
    return
  }
  func.func @transform_0(%arg0: i32) -> (i32, i32) {
    %c0_i32 = arith.constant 0 : i32
    %c0_i32_0 = arith.constant 0 : i32
    return %arg0, %c0_i32 : i32, i32
  }
  func.func @transform_1(%arg0: i32) -> (i32, i32) {
    %c0_i32 = arith.constant 0 : i32
    %c0_i32_0 = arith.constant 0 : i32
    %c0_i32_1 = arith.constant 0 : i32
    return %c0_i32, %c0_i32_0 : i32, i32
  }
  func.func @transform_2(%arg0: i32) -> (i32, i32) {
    %c0_i32 = arith.constant 0 : i32
    %c0_i32_0 = arith.constant 0 : i32
    %c0_i32_1 = arith.constant 0 : i32
    return %c0_i32, %c0_i32_0 : i32, i32
  }
  func.func @transform_3(%arg0: i32) -> (i32, i32) {
    %c0_i32 = arith.constant 0 : i32
    %c0_i32_0 = arith.constant 0 : i32
    return %arg0, %c0_i32 : i32, i32
  }
  func.func @transform_4(%arg0: i32) -> (i32, i32) {
    %c0_i32 = arith.constant 0 : i32
    %c0_i32_0 = arith.constant 0 : i32
    return %arg0, %c0_i32 : i32, i32
  }
  func.func @transform_5(%arg0: i32) -> (i32, i32) {
    %c0_i32 = arith.constant 0 : i32
    %c0_i32_0 = arith.constant 0 : i32
    return %arg0, %c0_i32 : i32, i32
  }
  func.func @transform_6(%arg0: i32) -> (i32, i32) {
    %c0_i32 = arith.constant 0 : i32
    %c0_i32_0 = arith.constant 0 : i32
    return %arg0, %c0_i32 : i32, i32
  }
}

</mosaic_0001>

<bundles_post_ra>
// kernel: wavepool.1
= control target key start
LH: loop header
LB: loop body
LE: loop exit
PB: predicated region body
PF: predicated region fallthrough
CT: control target
= control target key end

     0   :  { %12 = vsyncpa [#allocation3], 0  ;;  %s1171_s0 = inlined_call_operand.vmem [shape: f32[64,32], index: 0, kind: input, shape index: {}]   ;;  %s1172_s1 = inlined_call_operand.vmem [shape: f32[16,8], index: 1, kind: input, shape index: {}]   ;;  %s1173_s2 = inlined_call_operand.vmem [shape: f32[16,8], index: 2, kind: input, shape index: {}]   ;;  %s1174_s3 = inlined_call_operand.hbm [shape: f32[64,8], index: 3, kind: output, shape index: {0}]   ;;  %s1175_s4 = inlined_call_operand.hbm [shape: f32[64,8], index: 4, kind: output, shape index: {1}]   ;;  %s1176_s5 = inlined_call_operand.hbm [shape: f32[64,8], index: 5, kind: output, shape index: {2}]   ;;  %s1177_s6 = inlined_call_operand.hbm [shape: f32[64,8], index: 6, kind: output, shape index: {3}]  }
   0x1   :  { %13 = vsyncpa [#allocation5], 0  ;;  %v962_v0 = vld [vmem:[%s1171_s0] sm:$0xff]  ;;  %v967_v1 = vld [vmem:[%s1171_s0 + $0x10] sm:$0xff]  ;;  %s916_s25 = smov 16  }
   0x2   :  { %69 = vrot.lane.b32.xlu0 %v962_v0, %s916_s25  ;;  %73 = vrot.lane.b32.xlu1 %v967_v1, %s916_s25  ;;  %v974_v2 = vld [vmem:[%s1171_s0 + $0x8] sm:$0xff]  ;;  %v979_v3 = vld [vmem:[%s1171_s0 + $0x18] sm:$0xff] }
   0x3   :  { %14 = vsyncpa [#allocation8], 0  ;;  %v986_v4 = vld [vmem:[%s1171_s0 + $0x20] sm:$0xff]  ;;  %v991_v5 = vld [vmem:[%s1171_s0 + $0x28] sm:$0xff]  ;;  %vm105_vm0 = vcmask 130048   ;;  %vm235_vm1 = vcmask 64512  }
   0x4   :  { %v996_v6 = vld [vmem:[%s1172_s1 + $0x8] sm:$0xff]  ;;  %v1008_v8 = vld [vmem:[%s1172_s1] sm:$0xff]  ;;  %v1022_v10 = vld [vmem:[%s1171_s0 + $0x30] sm:$0xff]  ;;  %s919_s22 = smov [#allocation4]  }
   0x5   :  { %v1001_v7 = vld [vmem:[%s1173_s2 + $0x8] sm:$0xff]  ;;  %758 = vmatprep.subr.mxu0 %v996_v6  ;;  %v1013_v9 = vld [vmem:[%s1173_s2] sm:$0xff]  ;;  %v1027_v11 = vld [vmem:[%s1171_s0 + $0x38] sm:$0xff]  ;;  %s917_s2 = smov 112   ;;  %s918_s0 = smov [#allocation2]  }
   0x6   :  { %71 = vrot.lane.b32.xlu0 %v974_v2, %s916_s25  ;;  %75 = vrot.lane.b32.xlu1 %v979_v3, %s916_s25  ;;  %s628_s21 = sshll.u32 %s918_s0, 4  ;;  %s640_s23 = sshll.u32 %s919_s22, 4  ;;  %s629_s21 = int_to_ptr.vmem [resolvable:$true] %s628_s21  ;;  %s641_s23 = int_to_ptr.vmem [resolvable:$true] %s640_s23 }
   0x7   :  { %774 = vmatprep.subr.mxu1 %v1001_v7  ;;  %759 = vmatpush3.msra.mxu0 %v996_v6  ;;  %s830_s24 = scalar_lea.vmem %s629_s21, 1024  ;;  %p835_p1 = scmp.lt.s32.totalorder %s629_s21, %s629_s21 }
   0x8   :  { %775 = vmatpush3.msra.mxu1 %v1001_v7  ;;  %760 = vmatprep.subr.mxu0 %v1008_v8  ;;  %p831_p0 = scmp.ne.s32.totalorder %s629_s21, %s830_s24  ;;  %p836_p2 = scmp.lt.s32.totalorder %s830_s24, %s830_s24 }
   0x9   :  { %776 = vmatprep.subr.mxu1 %v1013_v9  ;;  %761 = vmatpush3.msra.mxu0 %v1008_v8 }
   0xa   :  { %77 = vrot.lane.b32.xlu0 %v986_v4, %s916_s25  ;;  %79 = vrot.lane.b32.xlu1 %v991_v5, %s916_s25  ;;  %p837_p3 = por %p836_p2, %p835_p1 }
   0xb   :  { %777 = vmatpush3.msra.mxu1 %v1013_v9  ;;  %790 = vmatprep.subr.mxu0 %v996_v6 }
   0xc   :  { %806 = vmatprep.subr.mxu1 %v1001_v7  ;;  %p838_p4 = pnand %p837_p3, %p831_p0 }
   0xe   :  { %81 = vrot.lane.b32.xlu0 %v1022_v10, %s916_s25  ;;  %83 = vrot.lane.b32.xlu1 %v1027_v11, %s916_s25 }
  0x12   :  { %37 = vrot.lane.b32.xlu0 %v962_v0, %s917_s2  ;;  %39 = vrot.lane.b32.xlu1 %v974_v2, %s917_s2 }
  0x16   :  { %41 = vrot.lane.b32.xlu0 %v967_v1, %s917_s2  ;;  %43 = vrot.lane.b32.xlu1 %v979_v3, %s917_s2 }
  0x1a   :  { %45 = vrot.lane.b32.xlu0 %v986_v4, %s917_s2  ;;  %47 = vrot.lane.b32.xlu1 %v991_v5, %s917_s2 }
  0x1e   :  { %49 = vrot.lane.b32.xlu0 %v1022_v10, %s917_s2  ;;  %51 = vrot.lane.b32.xlu1 %v1027_v11, %s917_s2 }
  0x74   :  { %v70_v12 = vpop.permute.xlu0 %69  ;;  %v74_v13 = vpop.permute.xlu1 %73 }
  0x75   :  { %v93_v14 = vsub.f32 %v962_v0, %v70_v12  ;;  %v95_v15 = vsub.f32 %v967_v1, %v74_v13 }
  0x77   :  { %365 = vrot.lane.b32.xlu0 %v93_v14, %s917_s2 }
  0x78   :  { %v72_v16 = vpop.permute.xlu0 %71  ;;  %v76_v17 = vpop.permute.xlu1 %75 }
  0x79   :  { %v94_v18 = vsub.f32 %v974_v2, %v72_v16  ;;  %v96_v19 = vsub.f32 %v979_v3, %v76_v17 }
  0x7b   :  { %369 = vrot.lane.b32.xlu0 %v95_v15, %s917_s2  ;;  %367 = vrot.lane.b32.xlu1 %v94_v18, %s917_s2 }
  0x7c   :  { %v78_v20 = vpop.permute.xlu0 %77  ;;  %v80_v21 = vpop.permute.xlu1 %79 }
  0x7d   :  { %v97_v22 = vsub.f32 %v986_v4, %v78_v20  ;;  %v98_v23 = vsub.f32 %v991_v5, %v80_v21 }
  0x7f   :  { %371 = vrot.lane.b32.xlu1 %v96_v19, %s917_s2  ;;  %373 = vrot.lane.b32.xlu0 %v97_v22, %s917_s2 }
  0x80   :  { %v82_v24 = vpop.permute.xlu0 %81  ;;  %v84_v25 = vpop.permute.xlu1 %83 }
  0x81   :  { %v99_v26 = vsub.f32 %v1022_v10, %v82_v24  ;;  %v100_v27 = vsub.f32 %v1027_v11, %v84_v25 }
  0x83   :  { %375 = vrot.lane.b32.xlu1 %v98_v23, %s917_s2  ;;  %377 = vrot.lane.b32.xlu0 %v99_v26, %s917_s2 }
  0x84   :  { %v38_v28 = vpop.permute.xlu0 %37  ;;  %v40_v29 = vpop.permute.xlu1 %39 }
  0x85   :  { %v61_v30 = vadd.f32 %v38_v28, %v962_v0  ;;  %v62_v31 = vadd.f32 %v40_v29, %v974_v2 }
  0x87   :  { %379 = vrot.lane.b32.xlu1 %v100_v27, %s917_s2  ;;  %762 = vmatprep.mubr.msk.f32.mxu0 %vm105_vm0, %v61_v30 }
  0x88   :  { %778 = vmatprep.mubr.msk.f32.mxu1 %vm105_vm0, %v61_v30  ;;  %763 = vmatmul.mubr.msk.f32.vlgmr.msra.gmra.mxu0 %vm105_vm0, %v62_v31  ;;  %v42_v32 = vpop.permute.xlu0 %41  ;;  %v44_v33 = vpop.permute.xlu1 %43 }
  0x89   :  { %779 = vmatmul.mubr.msk.f32.vlgmr.msra.gmra.mxu1 %vm105_vm0, %v62_v31  ;;  %v63_v34 = vadd.f32 %v42_v32, %v967_v1  ;;  %v64_v35 = vadd.f32 %v44_v33, %v979_v3  ;;  %791 = vmatpush3.msra.mxu0 %v996_v6 }
  0x8a   :  { %807 = vmatpush3.msra.mxu1 %v1001_v7  ;;  %792 = vmatprep.subr.mxu0 %v1008_v8 }
  0x8b   :  { %765 = vmatprep.mubr.msk.f32.mxu0 %vm105_vm0, %v63_v34  ;;  %781 = vmatprep.mubr.msk.f32.mxu1 %vm105_vm0, %v63_v34 }
  0x8c   :  { %766 = vmatmul.mubr.msk.f32.gmra.mxu0 %vm105_vm0, %v64_v35  ;;  %v46_v36 = vpop.permute.xlu0 %45  ;;  %v48_v37 = vpop.permute.xlu1 %47  ;;  %808 = vmatprep.subr.mxu1 %v1013_v9 }
  0x8d   :  { %782 = vmatmul.mubr.msk.f32.gmra.mxu1 %vm105_vm0, %v64_v35  ;;  %v65_v38 = vadd.f32 %v46_v36, %v986_v4  ;;  %v66_v39 = vadd.f32 %v48_v37, %v991_v5  ;;  %793 = vmatpush3.msra.mxu0 %v1008_v8 }
  0x8e   :  { %809 = vmatpush3.msra.mxu1 %v1013_v9 }
  0x8f   :  { %768 = vmatprep.mubr.msk.f32.mxu0 %vm105_vm0, %v65_v38  ;;  %784 = vmatprep.mubr.msk.f32.mxu1 %vm105_vm0, %v65_v38 }
  0x90   :  { %769 = vmatmul.mubr.msk.f32.gmra.mxu0 %vm105_vm0, %v66_v39  ;;  %v50_v40 = vpop.permute.xlu0 %49  ;;  %v52_v41 = vpop.permute.xlu1 %51 }
  0x91   :  { %785 = vmatmul.mubr.msk.f32.gmra.mxu1 %vm105_vm0, %v66_v39  ;;  %v67_v42 = vadd.f32 %v50_v40, %v1022_v10  ;;  %v68_v43 = vadd.f32 %v52_v41, %v1027_v11 }
  0x93   :  { %771 = vmatprep.mubr.msk.f32.mxu0 %vm105_vm0, %v67_v42  ;;  %787 = vmatprep.mubr.msk.f32.mxu1 %vm105_vm0, %v67_v42 }
  0x94   :  { %772 = vmatmul.mubr.msk.f32.gmra.mxu0 %vm105_vm0, %v68_v43 }
  0x95   :  { %788 = vmatmul.mubr.msk.f32.gmra.mxu1 %vm105_vm0, %v68_v43 }
  0xe9   :  { %v366_v44 = vpop.permute.xlu0 %365 }
  0xea   :  { %794 = vmatprep.mubr.msk.f32.mxu0 %vm105_vm0, %v366_v44  ;;  %810 = vmatprep.mubr.msk.f32.mxu1 %vm105_vm0, %v366_v44 }
  0xed   :  { %v368_v45 = vpop.permute.xlu1 %367  ;;  %v370_v46 = vpop.permute.xlu0 %369 }
  0xee   :  { %795 = vmatmul.mubr.msk.f32.vlgmr.msra.gmra.mxu0 %vm105_vm0, %v368_v45  ;;  %811 = vmatmul.mubr.msk.f32.vlgmr.msra.gmra.mxu1 %vm105_vm0, %v368_v45 }
  0xef   :  { %797 = vmatprep.mubr.msk.f32.mxu0 %vm105_vm0, %v370_v46  ;;  %813 = vmatprep.mubr.msk.f32.mxu1 %vm105_vm0, %v370_v46 }
  0xf1   :  { %v372_v47 = vpop.permute.xlu1 %371  ;;  %v374_v48 = vpop.permute.xlu0 %373 }
  0xf2   :  { %798 = vmatmul.mubr.msk.f32.gmra.mxu0 %vm105_vm0, %v372_v47  ;;  %814 = vmatmul.mubr.msk.f32.gmra.mxu1 %vm105_vm0, %v372_v47 }
  0xf3   :  { %800 = vmatprep.mubr.msk.f32.mxu0 %vm105_vm0, %v374_v48  ;;  %816 = vmatprep.mubr.msk.f32.mxu1 %vm105_vm0, %v374_v48 }
  0xf5   :  { %v376_v49 = vpop.permute.xlu1 %375  ;;  %v378_v50 = vpop.permute.xlu0 %377 }
  0xf6   :  { %801 = vmatmul.mubr.msk.f32.gmra.mxu0 %vm105_vm0, %v376_v49  ;;  %817 = vmatmul.mubr.msk.f32.gmra.mxu1 %vm105_vm0, %v376_v49 }
  0xf7   :  { %803 = vmatprep.mubr.msk.f32.mxu0 %vm105_vm0, %v378_v50  ;;  %819 = vmatprep.mubr.msk.f32.mxu1 %vm105_vm0, %v378_v50 }
  0xf9   :  { %v380_v51 = vpop.permute.xlu1 %379 }
  0xfa   :  { %804 = vmatmul.mubr.msk.f32.gmra.mxu0 %vm105_vm0, %v380_v51  ;;  %820 = vmatmul.mubr.msk.f32.gmra.mxu1 %vm105_vm0, %v380_v51 }
 0x148   :  { %v764_v52 = vpop.f32.mrf.mxu0 }
 0x149   :  { %237 = vst.msk [vmem:[#allocation2 + $0x8] sm:$0xff] %vm235_vm1, %v764_v52  ;;  %v780_v53 = vpop.f32.mrf.mxu1 }
 0x14a   :  { %350 = vst.msk [vmem:[#allocation4 + $0x8] sm:$0xff] %vm235_vm1, %v780_v53  ;;  %v196_v54 = vpop.f32.mrf.mxu0 }
 0x14b   :  { %236 = vst.msk [vmem:[#allocation2] sm:$0xff] %vm235_vm1, %v196_v54  ;;  %v310_v55 = vpop.f32.mrf.mxu1 }
 0x14c   :  { %349 = vst.msk [vmem:[#allocation4] sm:$0xff] %vm235_vm1, %v310_v55  ;;  %v767_v56 = vpop.f32.mrf.mxu0 }
 0x14d   :  { %239 = vst.msk [vmem:[#allocation2 + $0x18] sm:$0xff] %vm235_vm1, %v767_v56  ;;  %v783_v57 = vpop.f32.mrf.mxu1 }
 0x14e   :  { %352 = vst.msk [vmem:[#allocation4 + $0x18] sm:$0xff] %vm235_vm1, %v783_v57  ;;  %v206_v58 = vpop.f32.mrf.mxu0 }
 0x14f   :  { %238 = vst.msk [vmem:[#allocation2 + $0x10] sm:$0xff] %vm235_vm1, %v206_v58  ;;  %v320_v59 = vpop.f32.mrf.mxu1 }
 0x150   :  { %351 = vst.msk [vmem:[#allocation4 + $0x10] sm:$0xff] %vm235_vm1, %v320_v59  ;;  %v770_v60 = vpop.f32.mrf.mxu0 }
 0x151   :  { %241 = vst.msk [vmem:[#allocation2 + $0x28] sm:$0xff] %vm235_vm1, %v770_v60  ;;  %v786_v61 = vpop.f32.mrf.mxu1 }
 0x152   :  { %354 = vst.msk [vmem:[#allocation4 + $0x28] sm:$0xff] %vm235_vm1, %v786_v61  ;;  %v216_v62 = vpop.f32.mrf.mxu0 }
 0x153   :  { %240 = vst.msk [vmem:[#allocation2 + $0x20] sm:$0xff] %vm235_vm1, %v216_v62  ;;  %v330_v63 = vpop.f32.mrf.mxu1 }
 0x154   :  { %353 = vst.msk [vmem:[#allocation4 + $0x20] sm:$0xff] %vm235_vm1, %v330_v63  ;;  %v773_v0 = vpop.f32.mrf.mxu0 }
 0x155   :  { %243 = vst.msk [vmem:[#allocation2 + $0x38] sm:$0xff] %vm235_vm1, %v773_v0  ;;  %v789_v1 = vpop.f32.mrf.mxu1 }
 0x156   :  { %356 = vst.msk [vmem:[#allocation4 + $0x38] sm:$0xff] %vm235_vm1, %v789_v1  ;;  %v226_v2 = vpop.f32.mrf.mxu0 }
 0x157   :  { %242 = vst.msk [vmem:[#allocation2 + $0x30] sm:$0xff] %vm235_vm1, %v226_v2  ;;  %v340_v3 = vpop.f32.mrf.mxu1 }
 0x158   :  { %355 = vst.msk [vmem:[#allocation4 + $0x30] sm:$0xff] %vm235_vm1, %v340_v3 }
 0x159   :  { %841 = shalt.err (!%p838_p4)
}
 0x15a   :  { %s920_s25 = smov 128   ;;  %s921_s26 = smov 8  }
 0x15b   :  { %634 = dma.vmem_to_hbm [thread:$0]  %s629_s21, 1024, %s1174_s3, [#allocation3], %s920_s25, %s920_s25, %s921_s26  }
 0x15c   :  { %s850_s29 = scalar_lea.vmem %s641_s23, 1024  ;;  %p855_p6 = scmp.lt.s32.totalorder %s641_s23, %s641_s23 }
 0x15d   :  { %p851_p5 = scmp.ne.s32.totalorder %s641_s23, %s850_s29  ;;  %p856_p7 = scmp.lt.s32.totalorder %s850_s29, %s850_s29 }
 0x15f   :  { %p857_p8 = por %p856_p7, %p855_p6 }
 0x161   :  { %p858_p9 = pnand %p857_p8, %p851_p5 }
 0x163   :  { %861 = shalt.err (!%p858_p9)
}
 0x164   :  { %646 = dma.vmem_to_hbm [thread:$0]  %s641_s23, 1024, %s1175_s4, [#allocation5], %s920_s25, %s920_s25, %s921_s26  }
 0x165   :  { %s922_s3 = smov [#allocation6]   ;;  %s923_s8 = smov [#allocation7]  }
 0x166   :  { %s652_s4 = sshll.u32 %s922_s3, 4  ;;  %s664_s9 = sshll.u32 %s923_s8, 4  ;;  %s653_s4 = int_to_ptr.vmem [resolvable:$true] %s652_s4  ;;  %s665_s9 = int_to_ptr.vmem [resolvable:$true] %s664_s9 }
 0x167   :  { %s870_s10 = scalar_lea.vmem %s653_s4, 1024  ;;  %p875_p11 = scmp.lt.s32.totalorder %s653_s4, %s653_s4 }
 0x168   :  { %p871_p10 = scmp.ne.s32.totalorder %s653_s4, %s870_s10  ;;  %p876_p12 = scmp.lt.s32.totalorder %s870_s10, %s870_s10 }
 0x16a   :  { %p877_p13 = por %p876_p12, %p875_p11 }
 0x16c   :  { %p878_p0 = pnand %p877_p13, %p871_p10 }
 0x1ae   :  { %v796_v4 = vpop.f32.mrf.mxu0  ;;  %v812_v5 = vpop.f32.mrf.mxu1 }
 0x1af   :  { %503 = vst.msk [vmem:[#allocation6 + $0x8] sm:$0xff] %vm235_vm1, %v796_v4  ;;  %616 = vst.msk [vmem:[#allocation7 + $0x8] sm:$0xff] %vm235_vm1, %v812_v5 }
 0x1b0   :  { %v463_v6 = vpop.f32.mrf.mxu0  ;;  %v576_v7 = vpop.f32.mrf.mxu1 }
 0x1b1   :  { %502 = vst.msk [vmem:[#allocation6] sm:$0xff] %vm235_vm1, %v463_v6  ;;  %615 = vst.msk [vmem:[#allocation7] sm:$0xff] %vm235_vm1, %v576_v7 }
 0x1b2   :  { %v799_v8 = vpop.f32.mrf.mxu0  ;;  %v815_v9 = vpop.f32.mrf.mxu1 }
 0x1b3   :  { %505 = vst.msk [vmem:[#allocation6 + $0x18] sm:$0xff] %vm235_vm1, %v799_v8  ;;  %618 = vst.msk [vmem:[#allocation7 + $0x18] sm:$0xff] %vm235_vm1, %v815_v9 }
 0x1b4   :  { %v473_v10 = vpop.f32.mrf.mxu0  ;;  %v586_v11 = vpop.f32.mrf.mxu1 }
 0x1b5   :  { %504 = vst.msk [vmem:[#allocation6 + $0x10] sm:$0xff] %vm235_vm1, %v473_v10  ;;  %617 = vst.msk [vmem:[#allocation7 + $0x10] sm:$0xff] %vm235_vm1, %v586_v11 }
 0x1b6   :  { %v802_v12 = vpop.f32.mrf.mxu0  ;;  %v818_v13 = vpop.f32.mrf.mxu1 }
 0x1b7   :  { %507 = vst.msk [vmem:[#allocation6 + $0x28] sm:$0xff] %vm235_vm1, %v802_v12  ;;  %620 = vst.msk [vmem:[#allocation7 + $0x28] sm:$0xff] %vm235_vm1, %v818_v13 }
 0x1b8   :  { %v483_v14 = vpop.f32.mrf.mxu0  ;;  %v596_v15 = vpop.f32.mrf.mxu1 }
 0x1b9   :  { %506 = vst.msk [vmem:[#allocation6 + $0x20] sm:$0xff] %vm235_vm1, %v483_v14  ;;  %619 = vst.msk [vmem:[#allocation7 + $0x20] sm:$0xff] %vm235_vm1, %v596_v15 }
 0x1ba   :  { %v805_v16 = vpop.f32.mrf.mxu0  ;;  %v821_v17 = vpop.f32.mrf.mxu1 }
 0x1bb   :  { %509 = vst.msk [vmem:[#allocation6 + $0x38] sm:$0xff] %vm235_vm1, %v805_v16  ;;  %622 = vst.msk [vmem:[#allocation7 + $0x38] sm:$0xff] %vm235_vm1, %v821_v17 }
 0x1bc   :  { %v493_v18 = vpop.f32.mrf.mxu0  ;;  %v606_v19 = vpop.f32.mrf.mxu1 }
 0x1bd   :  { %508 = vst.msk [vmem:[#allocation6 + $0x30] sm:$0xff] %vm235_vm1, %v493_v18  ;;  %621 = vst.msk [vmem:[#allocation7 + $0x30] sm:$0xff] %vm235_vm1, %v606_v19 }
 0x1be   :  { %881 = shalt.err (!%p878_p0)
}
 0x1bf   :  { %658 = dma.vmem_to_hbm [thread:$0]  %s653_s4, 1024, %s1176_s5, [#allocation5], %s920_s25, %s920_s25, %s921_s26  }
 0x1c0   :  { %s890_s13 = scalar_lea.vmem %s665_s9, 1024  ;;  %p895_p2 = scmp.lt.s32.totalorder %s665_s9, %s665_s9 }
 0x1c1   :  { %p891_p1 = scmp.ne.s32.totalorder %s665_s9, %s890_s13  ;;  %p896_p3 = scmp.lt.s32.totalorder %s890_s13, %s890_s13 }
 0x1c3   :  { %p897_p4 = por %p896_p3, %p895_p2 }
 0x1c5   :  { %p898_p5 = pnand %p897_p4, %p891_p1 }
 0x1c7   :  { %901 = shalt.err (!%p898_p5)
}
 0x1c8   :  { %670 = dma.vmem_to_hbm [thread:$0]  %s665_s9, 1024, %s1177_s6, [#allocation8], %s920_s25, %s920_s25, %s921_s26  }
 0x1c9   :  { %910 = dma.done.wait [#allocation3], 1024  }
 0x1ca   :  { %911 = vsyncadd [#allocation3], 4294966272 }
 0x1cb   :  { %912 = dma.done.wait [#allocation5], 2048  }
 0x1cc   :  { %913 = vsyncadd [#allocation5], 4294965248 }
 0x1cd   :  { %914 = dma.done.wait [#allocation8], 1024  }
 0x1ce   :  { %915 = vsyncadd [#allocation8], 4294966272 }
 0x1cf   :  { %683 = vsyncpa [#allocation3], 1 }
 0x1d0   :  { %684 = vsyncpa [#allocation5], 1 }
 0x1d1   :  { %685 = vsyncpa [#allocation8], 1 }

</bundles_post_ra>
